<compile_context>
chip_gen: v5e
topology: v5e:2x2
jax: 0.10.0
libtpu: 0.0.40
codegen_flags: <defaults>
</compile_context>

<pallas_src>
import jax
import jax.numpy as jnp
from jax.experimental import pallas as pl
from jax.experimental.pallas import tpu as pltpu

VOCAB, EMB, H1, H2, OUT = 10, 16, 64, 16, 8
EPS = 1e-5


def text_encoder_kernel(tok_ref, t1_ref, b1_ref, w2_ref, b2_ref,
                        w3_ref, b3_ref, g_ref, beta_ref, out_ref):
    tok = tok_ref[...]                                            # (1, T) int32
    tile_n = tok.shape[1]

    # Embedding lookup + dense1 fused: one_hot is (VOCAB, T), weights (H1, VOCAB).
    vocab_iota = jax.lax.broadcasted_iota(jnp.int32, (VOCAB, tile_n), 0)
    one_hot = (vocab_iota == tok).astype(jnp.float32)             # (VOCAB, T)

    h = jnp.dot(t1_ref[...], one_hot,
                preferred_element_type=jnp.float32) + b1_ref[...]  # (H1, T)
    h = jnp.maximum(h, 0.0)

    h = jnp.dot(w2_ref[...], h,
                preferred_element_type=jnp.float32) + b2_ref[...]  # (H2, T)
    h = jnp.maximum(h, 0.0)

    h = jnp.dot(w3_ref[...], h,
                preferred_element_type=jnp.float32) + b3_ref[...]  # (OUT, T)

    # LayerNorm over the feature (sublane) axis — biased variance, like torch.
    mean = jnp.mean(h, axis=0, keepdims=True)
    var = jnp.mean((h - mean) ** 2, axis=0, keepdims=True)
    h = (h - mean) * jax.lax.rsqrt(var + EPS)
    out_ref[...] = h * g_ref[...] + beta_ref[...]                  # (OUT, T) lane-dense


def init_params(key):
    ks = jax.random.split(key, 8)
    emb = jax.random.normal(ks[0], (VOCAB, EMB), jnp.float32) * 0.1
    w1 = jax.random.normal(ks[1], (H1, EMB), jnp.float32) * 0.1   # torch Linear: (out, in)
    b1 = jax.random.normal(ks[2], (H1,), jnp.float32) * 0.1
    w2 = jax.random.normal(ks[3], (H2, H1), jnp.float32) * 0.1
    b2 = jax.random.normal(ks[4], (H2,), jnp.float32) * 0.1
    w3 = jax.random.normal(ks[5], (OUT, H2), jnp.float32) * 0.1
    b3 = jax.random.normal(ks[6], (OUT,), jnp.float32) * 0.1
    gamma = jnp.ones((OUT,), jnp.float32)
    beta = jnp.zeros((OUT,), jnp.float32)
    return emb, w1, b1, w2, b2, w3, b3, gamma, beta


def text_encoder(tokens, params, tile_n=2048):
    emb, w1, b1, w2, b2, w3, b3, gamma, beta = params
    B, S = tokens.shape
    N = B * S

    # Adapt the tile to small inputs; keep it a multiple of 128 (lane width).
    tile_n = min(tile_n, ((N + 127) // 128) * 128)
    n_pad = pl.cdiv(N, tile_n) * tile_n

    tok = tokens.reshape(N).astype(jnp.int32)
    tok = jnp.pad(tok, (0, n_pad - N)).reshape(1, n_pad)          # lane-packed tokens

    # Fold embedding into dense1: (emb @ w1.T).T == w1 @ emb.T  -> (H1, VOCAB).
    table_t = w1 @ emb.T

    full = lambda i: (0, 0)   # resident weight blocks
    weight_bytes = 4 * (H1 * VOCAB + H1 + H2 * H1 + H2 + OUT * H2 + OUT + 2 * OUT)
    cost = pl.CostEstimate(
        flops=2 * n_pad * (VOCAB * H1 + H1 * H2 + H2 * OUT),
        transcendentals=0,
        bytes_accessed=n_pad * 4 + n_pad * OUT * 4 + weight_bytes,
    )

    out = pl.pallas_call(
        text_encoder_kernel,
        out_shape=jax.ShapeDtypeStruct((OUT, n_pad), jnp.float32),
        grid=(n_pad // tile_n,),
        in_specs=[
            pl.BlockSpec((1, tile_n), lambda i: (0, i)),          # tokens
            pl.BlockSpec((H1, VOCAB), full),                      # folded emb+dense1
            pl.BlockSpec((H1, 1), full),                          # b1
            pl.BlockSpec((H2, H1), full),                         # w2
            pl.BlockSpec((H2, 1), full),                          # b2
            pl.BlockSpec((OUT, H2), full),                        # w3
            pl.BlockSpec((OUT, 1), full),                         # b3
            pl.BlockSpec((OUT, 1), full),                         # gamma
            pl.BlockSpec((OUT, 1), full),                         # beta
        ],
        out_specs=pl.BlockSpec((OUT, tile_n), lambda i: (0, i)),
        compiler_params=pltpu.CompilerParams(
            dimension_semantics=("parallel",)),
        cost_estimate=cost,
    )(
        tok,
        table_t,
        b1.reshape(-1, 1),
        w2, b2.reshape(-1, 1),
        w3, b3.reshape(-1, 1),
        gamma.reshape(-1, 1), beta.reshape(-1, 1),
    )
    return out[:, :N].T.reshape(B, S, OUT)


def text_encoder_ref(tokens, params):
    emb, w1, b1, w2, b2, w3, b3, gamma, beta = params
    x = emb[tokens]
    x = jax.nn.relu(x @ w1.T + b1)
    x = jax.nn.relu(x @ w2.T + b2)
    x = x @ w3.T + b3
    mean = jnp.mean(x, axis=-1, keepdims=True)
    var = jnp.mean((x - mean) ** 2, axis=-1, keepdims=True)
    return (x - mean) / jnp.sqrt(var + EPS) * gamma + beta


if __name__ == "__main__":
    key = jax.random.PRNGKey(0)
    pkey, tkey = jax.random.split(key)
    params = init_params(pkey)

    B, S = 2, 8
    tokens = jax.random.randint(tkey, (B, S), 0, VOCAB, dtype=jnp.int32)

    out = text_encoder(tokens, params)
    out = jax.block_until_ready(out)

    ref = text_encoder_ref(tokens, params)
    assert out.shape == (B, S, OUT)
    assert jnp.allclose(out, ref, atol=1e-5, rtol=1e-5), "mismatch vs reference"

    print("KERNEL_OK")
</pallas_src>

<mosaic_0001>
module attributes {stable_mosaic.version = 11 : i64} {
  func.func @text_encoder_kernel(%arg0: i32, %arg1: memref<1x128xi32, #tpu.memory_space<vmem>>, %arg2: memref<64x10xf32, #tpu.memory_space<vmem>>, %arg3: memref<64x1xf32, #tpu.memory_space<vmem>>, %arg4: memref<16x64xf32, #tpu.memory_space<vmem>>, %arg5: memref<16x1xf32, #tpu.memory_space<vmem>>, %arg6: memref<8x16xf32, #tpu.memory_space<vmem>>, %arg7: memref<8x1xf32, #tpu.memory_space<vmem>>, %arg8: memref<8x1xf32, #tpu.memory_space<vmem>>, %arg9: memref<8x1xf32, #tpu.memory_space<vmem>>, %arg10: memref<8x128xf32, #tpu.memory_space<vmem>>) attributes {dimension_semantics = [#tpu.dimension_semantics<parallel>], iteration_bounds = array<i64: 1>, scalar_prefetch = 0 : i64, scratch_operands = 0 : i64, tpu.core_type = #tpu.core_type<tc>, window_params = [{transform_indices = @transform_0, window_bounds = array<i64: 1, 128>}, {pipeline_mode = #tpu.pipeline_mode<synchronous>, transform_indices = @transform_1, window_bounds = array<i64: 64, 10>}, {pipeline_mode = #tpu.pipeline_mode<synchronous>, transform_indices = @transform_2, window_bounds = array<i64: 64, 1>}, {pipeline_mode = #tpu.pipeline_mode<synchronous>, transform_indices = @transform_3, window_bounds = array<i64: 16, 64>}, {pipeline_mode = #tpu.pipeline_mode<synchronous>, transform_indices = @transform_4, window_bounds = array<i64: 16, 1>}, {pipeline_mode = #tpu.pipeline_mode<synchronous>, transform_indices = @transform_5, window_bounds = array<i64: 8, 16>}, {pipeline_mode = #tpu.pipeline_mode<synchronous>, transform_indices = @transform_6, window_bounds = array<i64: 8, 1>}, {pipeline_mode = #tpu.pipeline_mode<synchronous>, transform_indices = @transform_7, window_bounds = array<i64: 8, 1>}, {pipeline_mode = #tpu.pipeline_mode<synchronous>, transform_indices = @transform_8, window_bounds = array<i64: 8, 1>}, {transform_indices = @transform_9, window_bounds = array<i64: 8, 128>}]} {
    %c0 = arith.constant 0 : index
    %c0_0 = arith.constant 0 : index
    %0 = vector.load %arg1[%c0, %c0_0] : memref<1x128xi32, #tpu.memory_space<vmem>>, vector<1x128xi32>
    %1 = tpu.iota {dimensions = array<i32: 0>} : vector<10x128xi32>
    %2 = vector.broadcast %0 : vector<1x128xi32> to vector<10x128xi32>
    %3 = arith.cmpi eq, %1, %2 : vector<10x128xi32>
    %4 = arith.extui %3 : vector<10x128xi1> to vector<10x128xi32>
    %5 = arith.sitofp %4 : vector<10x128xi32> to vector<10x128xf32>
    %c0_1 = arith.constant 0 : index
    %c0_2 = arith.constant 0 : index
    %6 = vector.load %arg2[%c0_1, %c0_2] : memref<64x10xf32, #tpu.memory_space<vmem>>, vector<64x10xf32>
    %cst = arith.constant dense<0.000000e+00> : vector<64x128xf32>
    %7 = tpu.matmul %6, %5, %cst {dimension_numbers = #tpu.dot_dimension_numbers<[1], [0], [0], [1], [0, 0, 1, 1], [], []>} : vector<64x10xf32>, vector<10x128xf32>, vector<64x128xf32> -> vector<64x128xf32>
    %c0_3 = arith.constant 0 : index
    %c0_4 = arith.constant 0 : index
    %8 = vector.load %arg3[%c0_3, %c0_4] : memref<64x1xf32, #tpu.memory_space<vmem>>, vector<64x1xf32>
    %9 = vector.broadcast %8 : vector<64x1xf32> to vector<64x128xf32>
    %10 = arith.addf %7, %9 : vector<64x128xf32>
    %cst_5 = arith.constant 0.000000e+00 : f32
    %11 = vector.broadcast %cst_5 : f32 to vector<64x128xf32>
    %12 = arith.maximumf %10, %11 : vector<64x128xf32>
    %c0_6 = arith.constant 0 : index
    %c0_7 = arith.constant 0 : index
    %13 = vector.load %arg4[%c0_6, %c0_7] : memref<16x64xf32, #tpu.memory_space<vmem>>, vector<16x64xf32>
    %cst_8 = arith.constant dense<0.000000e+00> : vector<16x128xf32>
    %14 = tpu.matmul %13, %12, %cst_8 {dimension_numbers = #tpu.dot_dimension_numbers<[1], [0], [0], [1], [0, 0, 1, 1], [], []>} : vector<16x64xf32>, vector<64x128xf32>, vector<16x128xf32> -> vector<16x128xf32>
    %c0_9 = arith.constant 0 : index
    %c0_10 = arith.constant 0 : index
    %15 = vector.load %arg5[%c0_9, %c0_10] : memref<16x1xf32, #tpu.memory_space<vmem>>, vector<16x1xf32>
    %16 = vector.broadcast %15 : vector<16x1xf32> to vector<16x128xf32>
    %17 = arith.addf %14, %16 : vector<16x128xf32>
    %cst_11 = arith.constant 0.000000e+00 : f32
    %18 = vector.broadcast %cst_11 : f32 to vector<16x128xf32>
    %19 = arith.maximumf %17, %18 : vector<16x128xf32>
    %c0_12 = arith.constant 0 : index
    %c0_13 = arith.constant 0 : index
    %20 = vector.load %arg6[%c0_12, %c0_13] : memref<8x16xf32, #tpu.memory_space<vmem>>, vector<8x16xf32>
    %cst_14 = arith.constant dense<0.000000e+00> : vector<8x128xf32>
    %21 = tpu.matmul %20, %19, %cst_14 {dimension_numbers = #tpu.dot_dimension_numbers<[1], [0], [0], [1], [0, 0, 1, 1], [], []>} : vector<8x16xf32>, vector<16x128xf32>, vector<8x128xf32> -> vector<8x128xf32>
    %c0_15 = arith.constant 0 : index
    %c0_16 = arith.constant 0 : index
    %22 = vector.load %arg7[%c0_15, %c0_16] : memref<8x1xf32, #tpu.memory_space<vmem>>, vector<8x1xf32>
    %23 = vector.broadcast %22 : vector<8x1xf32> to vector<8x128xf32>
    %24 = arith.addf %21, %23 : vector<8x128xf32>
    %cst_17 = arith.constant dense<0.000000e+00> : vector<128xf32>
    %25 = vector.multi_reduction <add>, %24, %cst_17 [0] : vector<8x128xf32> to vector<128xf32>
    %26 = vector.shape_cast %25 : vector<128xf32> to vector<1x128xf32>
    %cst_18 = arith.constant 8.000000e+00 : f32
    %27 = vector.broadcast %cst_18 : f32 to vector<1x128xf32>
    %28 = arith.divf %26, %27 : vector<1x128xf32>
    %29 = vector.broadcast %28 : vector<1x128xf32> to vector<8x128xf32>
    %30 = arith.subf %24, %29 : vector<8x128xf32>
    %31 = arith.mulf %30, %30 : vector<8x128xf32>
    %cst_19 = arith.constant dense<0.000000e+00> : vector<128xf32>
    %32 = vector.multi_reduction <add>, %31, %cst_19 [0] : vector<8x128xf32> to vector<128xf32>
    %33 = vector.shape_cast %32 : vector<128xf32> to vector<1x128xf32>
    %cst_20 = arith.constant 8.000000e+00 : f32
    %34 = vector.broadcast %cst_20 : f32 to vector<1x128xf32>
    %35 = arith.divf %33, %34 : vector<1x128xf32>
    %36 = vector.broadcast %28 : vector<1x128xf32> to vector<8x128xf32>
    %37 = arith.subf %24, %36 : vector<8x128xf32>
    %cst_21 = arith.constant 9.99999974E-6 : f32
    %38 = vector.broadcast %cst_21 : f32 to vector<1x128xf32>
    %39 = arith.addf %35, %38 : vector<1x128xf32>
    %40 = math.rsqrt %39 : vector<1x128xf32>
    %41 = vector.broadcast %40 : vector<1x128xf32> to vector<8x128xf32>
    %42 = arith.mulf %37, %41 : vector<8x128xf32>
    %c0_22 = arith.constant 0 : index
    %c0_23 = arith.constant 0 : index
    %43 = vector.load %arg8[%c0_22, %c0_23] : memref<8x1xf32, #tpu.memory_space<vmem>>, vector<8x1xf32>
    %44 = vector.broadcast %43 : vector<8x1xf32> to vector<8x128xf32>
    %45 = arith.mulf %42, %44 : vector<8x128xf32>
    %c0_24 = arith.constant 0 : index
    %c0_25 = arith.constant 0 : index
    %46 = vector.load %arg9[%c0_24, %c0_25] : memref<8x1xf32, #tpu.memory_space<vmem>>, vector<8x1xf32>
    %47 = vector.broadcast %46 : vector<8x1xf32> to vector<8x128xf32>
    %48 = arith.addf %45, %47 : vector<8x128xf32>
    %c0_26 = arith.constant 0 : index
    %c0_27 = arith.constant 0 : index
    %49 = vector.load %arg10[%c0_26, %c0_27] : memref<8x128xf32, #tpu.memory_space<vmem>>, vector<8x128xf32>
    tpu.vector_store %arg10[%c0_26, %c0_27], %48 {strides = array<i32>} : memref<8x128xf32, #tpu.memory_space<vmem>>, vector<8x128xf32>,
    return
  }
  func.func @transform_0(%arg0: i32) -> (i32, i32) {
    %c0_i32 = arith.constant 0 : i32
    %c0_i32_0 = arith.constant 0 : i32
    return %c0_i32, %arg0 : i32, i32
  }
  func.func @transform_1(%arg0: i32) -> (i32, i32) {
    %c0_i32 = arith.constant 0 : i32
    %c0_i32_0 = arith.constant 0 : i32
    %c0_i32_1 = arith.constant 0 : i32
    return %c0_i32, %c0_i32_0 : i32, i32
  }
  func.func @transform_2(%arg0: i32) -> (i32, i32) {
    %c0_i32 = arith.constant 0 : i32
    %c0_i32_0 = arith.constant 0 : i32
    %c0_i32_1 = arith.constant 0 : i32
    return %c0_i32, %c0_i32_0 : i32, i32
  }
  func.func @transform_3(%arg0: i32) -> (i32, i32) {
    %c0_i32 = arith.constant 0 : i32
    %c0_i32_0 = arith.constant 0 : i32
    %c0_i32_1 = arith.constant 0 : i32
    return %c0_i32, %c0_i32_0 : i32, i32
  }
  func.func @transform_4(%arg0: i32) -> (i32, i32) {
    %c0_i32 = arith.constant 0 : i32
    %c0_i32_0 = arith.constant 0 : i32
    %c0_i32_1 = arith.constant 0 : i32
    return %c0_i32, %c0_i32_0 : i32, i32
  }
  func.func @transform_5(%arg0: i32) -> (i32, i32) {
    %c0_i32 = arith.constant 0 : i32
    %c0_i32_0 = arith.constant 0 : i32
    %c0_i32_1 = arith.constant 0 : i32
    return %c0_i32, %c0_i32_0 : i32, i32
  }
  func.func @transform_6(%arg0: i32) -> (i32, i32) {
    %c0_i32 = arith.constant 0 : i32
    %c0_i32_0 = arith.constant 0 : i32
    %c0_i32_1 = arith.constant 0 : i32
    return %c0_i32, %c0_i32_0 : i32, i32
  }
  func.func @transform_7(%arg0: i32) -> (i32, i32) {
    %c0_i32 = arith.constant 0 : i32
    %c0_i32_0 = arith.constant 0 : i32
    %c0_i32_1 = arith.constant 0 : i32
    return %c0_i32, %c0_i32_0 : i32, i32
  }
  func.func @transform_8(%arg0: i32) -> (i32, i32) {
    %c0_i32 = arith.constant 0 : i32
    %c0_i32_0 = arith.constant 0 : i32
    %c0_i32_1 = arith.constant 0 : i32
    return %c0_i32, %c0_i32_0 : i32, i32
  }
  func.func @transform_9(%arg0: i32) -> (i32, i32) {
    %c0_i32 = arith.constant 0 : i32
    %c0_i32_0 = arith.constant 0 : i32
    return %c0_i32, %arg0 : i32, i32
  }
}

</mosaic_0001>

<bundles_post_ra>
// kernel: tpu_custom_call.1
= control target key start
LH: loop header
LB: loop body
LE: loop exit
PB: predicated region body
PF: predicated region fallthrough
CT: control target
= control target key end

     0   :  { %v34_v0 = vlaneseq  ;;  %v377_v4 = vmov 0   ;;  %vm125_vm0 = vcmask 1041408   ;;  %v378_v8 = vmov 0.0   ;;  %s518_s0 = inlined_call_operand.vmem [shape: s32[1,128], index: 0, kind: input, shape index: {}]   ;;  %s519_s1 = inlined_call_operand.vmem [shape: f32[64,10], index: 1, kind: input, shape index: {}]   ;;  %s520_s2 = inlined_call_operand.vmem [shape: f32[64,1], index: 2, kind: input, shape index: {}]   ;;  %s521_s3 = inlined_call_operand.vmem [shape: f32[16,64], index: 3, kind: input, shape index: {}]   ;;  %s522_s4 = inlined_call_operand.vmem [shape: f32[16,1], index: 4, kind: input, shape index: {}]   ;;  %s523_s5 = inlined_call_operand.vmem [shape: f32[8,16], index: 5, kind: input, shape index: {}]   ;;  %s524_s6 = inlined_call_operand.vmem [shape: f32[8,1], index: 6, kind: input, shape index: {}]   ;;  %s525_s7 = inlined_call_operand.vmem [shape: f32[8,1], index: 7, kind: input, shape index: {}]   ;;  %s526_s8 = inlined_call_operand.vmem [shape: f32[8,1], index: 8, kind: input, shape index: {}]   ;;  %s527_s9 = inlined_call_operand.hbm [shape: f32[8,128], index: 9, kind: output, shape index: {}]  }
   0x1   :  { %v59_v1 = vld [vmem:[%s520_s2 + $0x38] sm:$0xff]  ;;  %v346_v3 = vld [vmem:[%s518_s0] ss:$0 sm:$0xff]  ;;  %343 = vset.pattern.permute.xlu0 %v377_v4  ;;  %344 = vset.pattern.permute.xlu1 %v377_v4  ;;  %v57_v5 = vld [vmem:[%s520_s2 + $0x28] sm:$0xff]  ;;  %vm100_vm3 = vcmask 80896  }
   0x2   :  { %v35_v2 = vshrl.u32 %v34_v0, 7  ;;  %97 = vperm.xlu0 %343, %v59_v1   ;;  %87 = vperm.xlu1 %344, %v57_v5   ;;  %v55_v7 = vld [vmem:[%s520_s2 + $0x18] sm:$0xff]  ;;  %v48_v10 = vld [vmem:[%s519_s1 + $0x20] sm:$0xff] }
   0x3   :  { %345 = vset.pattern.permute.xlu2 %v377_v4  ;;  %v44_v11 = vld [vmem:[%s519_s1] sm:$0xff] }
   0x4   :  { %v36_v6 = vadd.s32 8, %v35_v2  ;;  %vm38_vm2 = vcmp.eq.s32.totalorder %v35_v2, %v346_v3  ;;  %77 = vperm.xlu2 %345, %v55_v7  }
   0x6   :  { %vm39_vm1 = vcmp.eq.s32.totalorder %v36_v6, %v346_v3 }
   0x7   :  { %v322_v9 = vsel %vm39_vm1, 1.0, %v378_v8 }
   0x8   :  { %336 = vmatpush.msk.msra.mxu3 %vm125_vm0, %v322_v9  ;;  %323 = vmatpush.msk.msra.mxu0 %vm125_vm0, %v322_v9 }
   0x9   :  { %14 = vsyncpa [#allocation3], 0  ;;  %v58_v12 = vld [vmem:[%s520_s2 + $0x30] sm:$0xff]  ;;  %v56_v13 = vld [vmem:[%s520_s2 + $0x20] sm:$0xff]  ;;  %v379_v14 = vmov 1.0   ;;  %vm192_vm4 = vcmask 523264  }
   0xa   :  { %337 = vmatpush.msk.msra.mxu3 %vm38_vm2, %v379_v14  ;;  %324 = vmatpush.msk.msra.mxu0 %vm38_vm2, %v379_v14  ;;  %v54_v15 = vld [vmem:[%s520_s2 + $0x10] sm:$0xff]  ;;  %v49_v16 = vld [vmem:[%s519_s1 + $0x28] sm:$0xff]  ;;  %v52_v19 = vld [vmem:[%s520_s2] sm:$0xff]  ;;  %vm231_vm5 = vcmask 130048   ;;  %v380_v8 = vmov 8.0   ;;  %s312_s11 = sshll.u32 %s527_s9, 4  ;;  %s313_s11 = int_to_ptr.hbm [resolvable:$true] %s312_s11 }
   0xb   :  { %329 = vmatmul.msk.f32.vlgmr.msra.gmra.mxu3 %vm100_vm3, %v48_v10  ;;  %325 = vmatmul.msk.f32.vlgmr.msra.gmra.mxu0 %vm100_vm3, %v44_v11  ;;  %v45_v17 = vld [vmem:[%s519_s1 + $0x8] sm:$0xff]  ;;  %v50_v21 = vld [vmem:[%s519_s1 + $0x30] sm:$0xff]  ;;  %v180_v23 = vld [vmem:[%s522_s4] sm:$0xff]  ;;  %347 = vrcp.f32 %v380_v8 }
   0xc   :  { %92 = vperm.xlu0 %343, %v58_v12   ;;  %82 = vperm.xlu1 %344, %v56_v13   ;;  %v53_v18 = vld [vmem:[%s520_s2 + $0x8] sm:$0xff]  ;;  %v46_v22 = vld [vmem:[%s519_s1 + $0x10] sm:$0xff]  ;;  %v225_v24 = vld [vmem:[%s524_s6] sm:$0xff] }
   0xd   :  { %72 = vperm.xlu2 %345, %v54_v15   ;;  %v181_v20 = vld [vmem:[%s522_s4 + $0x8] sm:$0xff]  ;;  %v290_v25 = vld [vmem:[%s525_s7] sm:$0xff]  ;;  %v51_v26 = vld [vmem:[%s519_s1 + $0x38] sm:$0xff] }
   0xe   :  { %v47_v27 = vld [vmem:[%s519_s1 + $0x18] sm:$0xff]  ;;  %v297_v28 = vld [vmem:[%s526_s8] sm:$0xff]  ;;  %v179_v62 = vld [vmem:[%s521_s3 + $0x8] sm:$0xff] }
   0xf   :  { %v178_v61 = vld [vmem:[%s521_s3] sm:$0xff]  ;;  %s381_s3 = smov [#allocation2]  }
  0x10   :  { %v224_v7 = vld [vmem:[%s523_s5] sm:$0xff]  ;;  %s310_s5 = sshll.u32 %s381_s3, 4  ;;  %s311_s5 = int_to_ptr.vmem [resolvable:$true] %s310_s5 }
  0x11   :  { %v348_v9 = vpop.eup %347 }
  0x12   :  { %v262_v10 = vmul.f32 8.0, %v348_v9  ;;  %vm266_vm6 = vweird.f32 %v348_v9 }
  0x13   :  { %330 = vmatmul.msk.f32.gmra.mxu3 %vm100_vm3, %v49_v16  ;;  %326 = vmatmul.msk.f32.gmra.mxu0 %vm100_vm3, %v45_v17 }
  0x14   :  { %67 = vperm.xlu0 %343, %v53_v18   ;;  %62 = vperm.xlu1 %344, %v52_v19   ;;  %v263_v13 = vsub.f32 1.0, %v262_v10 }
  0x15   :  { %189 = vperm.xlu2 %345, %v181_v20  }
  0x16   :  { %v264_v16 = vmul.f32 %v348_v9, %v263_v13 }
  0x18   :  { %v265_v19 = vadd.f32 %v348_v9, %v264_v16 }
  0x1b   :  { %331 = vmatmul.msk.f32.gmra.mxu3 %vm100_vm3, %v50_v21  ;;  %327 = vmatmul.msk.f32.gmra.mxu0 %vm100_vm3, %v46_v22  ;;  %v267_v22 = vsel %vm266_vm6, %v348_v9, %v265_v19 }
  0x1c   :  { %184 = vperm.xlu0 %343, %v180_v23   ;;  %228 = vperm.xlu1 %344, %v225_v24  }
  0x1d   :  { %293 = vperm.xlu2 %345, %v290_v25  }
  0x23   :  { %332 = vmatmul.msk.f32.gmra.mxu3 %vm100_vm3, %v51_v26  ;;  %328 = vmatmul.msk.f32.gmra.mxu0 %vm100_vm3, %v47_v27 }
  0x24   :  { %300 = vperm.xlu0 %343, %v297_v28  }
  0x5e   :  { %v78_v37 = vpop.permute.xlu2 %77 }
  0x67   :  { %v73_v50 = vpop.permute.xlu2 %72 }
  0x6f   :  { %v190_v0 = vpop.permute.xlu2 %189 }
  0x74   :  { %v98_v33 = vpop.permute.xlu0 %97  ;;  %v88_v34 = vpop.permute.xlu1 %87 }
  0x7e   :  { %v93_v38 = vpop.permute.xlu0 %92  ;;  %v83_v39 = vpop.permute.xlu1 %82 }
  0x86   :  { %v68_v53 = vpop.permute.xlu0 %67  ;;  %v63_v54 = vpop.permute.xlu1 %62 }
  0x88   :  { %v146_v29 = vpop.f32.mrf.mxu0 }
  0x89   :  { %v147_v57 = vadd.f32 %v146_v29, %v63_v54 }
  0x8b   :  { %v170_v60 = vmax.f32 %v147_v57, 0.0 }
  0x8e   :  { %v158_v30 = vpop.f32.mrf.mxu3  ;;  %v185_v1 = vpop.permute.xlu0 %184 }
  0x8f   :  { %v159_v46 = vadd.f32 %v158_v30, %v83_v39  ;;  %v229_v11 = vpop.permute.xlu1 %228 }
  0x90   :  { %v149_v32 = vpop.f32.mrf.mxu0 }
  0x91   :  { %v174_v51 = vmax.f32 %v159_v46, 0.0  ;;  %v150_v55 = vadd.f32 %v149_v32, %v68_v53 }
  0x93   :  { %v171_v59 = vmax.f32 %v150_v55, 0.0 }
  0x96   :  { %v161_v31 = vpop.f32.mrf.mxu3 }
  0x97   :  { %v162_v43 = vadd.f32 %v161_v31, %v88_v34 }
  0x98   :  { %v152_v36 = vpop.f32.mrf.mxu0 }
  0x99   :  { %v175_v48 = vmax.f32 %v162_v43, 0.0  ;;  %v153_v52 = vadd.f32 %v152_v36, %v73_v50  ;;  %v294_v43 = vpop.permute.xlu2 %293 }
  0x9b   :  { %v172_v58 = vmax.f32 %v153_v52, 0.0 }
  0x9e   :  { %v164_v35 = vpop.f32.mrf.mxu3 }
  0x9f   :  { %v165_v41 = vadd.f32 %v164_v35, %v93_v38 }
  0xa0   :  { %v155_v45 = vpop.f32.mrf.mxu0 }
  0xa1   :  { %v176_v47 = vmax.f32 %v165_v41, 0.0  ;;  %v156_v49 = vadd.f32 %v155_v45, %v78_v37  ;;  %v301_v45 = vpop.permute.xlu0 %300 }
  0xa3   :  { %v173_v56 = vmax.f32 %v156_v49, 0.0 }
  0xa6   :  { %v167_v40 = vpop.f32.mrf.mxu3 }
  0xa7   :  { %v168_v42 = vadd.f32 %v167_v40, %v98_v33 }
  0xa9   :  { %v177_v44 = vmax.f32 %v168_v42, 0.0 }
  0xab   :  { %207 = vmatpush.msra.mxu1 %v177_v44 }
  0xad   :  { %208 = vmatpush.msra.mxu1 %v176_v47 }
  0xaf   :  { %209 = vmatpush.msra.mxu1 %v175_v48 }
  0xb1   :  { %210 = vmatpush.msra.mxu1 %v174_v51 }
  0xb3   :  { %211 = vmatpush.msra.mxu1 %v173_v56 }
  0xb5   :  { %212 = vmatpush.msra.mxu1 %v172_v58 }
  0xb7   :  { %213 = vmatpush.msra.mxu1 %v171_v59 }
  0xb9   :  { %214 = vmatpush.msra.mxu1 %v170_v60 }
  0xba   :  { %333 = vmatmul.msk.f32.vlgmr.msra.gmra.mxu1 %vm192_vm4, %v178_v61 }
  0xc2   :  { %334 = vmatmul.msk.f32.gmra.mxu1 %vm192_vm4, %v179_v62 }
 0x137   :  { %v216_v63 = vpop.f32.mrf.mxu1 }
 0x138   :  { %v217_v3 = vadd.f32 %v216_v63, %v185_v1 }
 0x13a   :  { %v222_v6 = vmax.f32 %v217_v3, 0.0 }
 0x13f   :  { %v219_v2 = vpop.f32.mrf.mxu1 }
 0x140   :  { %v220_v4 = vadd.f32 %v219_v2, %v190_v0 }
 0x142   :  { %v223_v5 = vmax.f32 %v220_v4, 0.0 }
 0x144   :  { %249 = vmatpush.msra.mxu2 %v223_v5 }
 0x146   :  { %250 = vmatpush.msra.mxu2 %v222_v6 }
 0x147   :  { %335 = vmatmul.msk.f32.vlgmr.msra.gmra.mxu2 %vm231_vm5, %v224_v7 }
 0x1ca   :  { %v252_v12 = vpop.f32.mrf.mxu2 }
 0x1cb   :  { %v253_v14 = vadd.f32 %v252_v12, %v229_v11 }
 0x1cd   :  { %v255_v15 = vrot.slane %v253_v14, 4 }
 0x1cf   :  { %v256_v17 = vadd.f32 %v255_v15, %v253_v14 }
 0x1d1   :  { %v257_v18 = vrot.slane %v256_v17, 2 }
 0x1d3   :  { %v258_v20 = vadd.f32 %v257_v18, %v256_v17 }
 0x1d5   :  { %v259_v21 = vrot.slane %v258_v20, 1 }
 0x1d7   :  { %v260_v23 = vadd.f32 %v259_v21, %v258_v20 }
 0x1d9   :  { %v268_v24 = vmul.f32 %v267_v22, %v260_v23 }
 0x1db   :  { %v269_v25 = vsub.f32 %v253_v14, %v268_v24 }
 0x1dd   :  { %v270_v26 = vmul.f32 %v269_v25, %v269_v25 }
 0x1df   :  { %v271_v27 = vrot.slane %v270_v26, 4 }
 0x1e1   :  { %v272_v28 = vadd.f32 %v271_v27, %v270_v26 }
 0x1e3   :  { %v273_v29 = vrot.slane %v272_v28, 2 }
 0x1e5   :  { %v274_v30 = vadd.f32 %v273_v29, %v272_v28 }
 0x1e7   :  { %v275_v31 = vrot.slane %v274_v30, 1 }
 0x1e9   :  { %v276_v32 = vadd.f32 %v275_v31, %v274_v30 }
 0x1eb   :  { %v277_v33 = vmul.f32 %v276_v32, %v267_v22 }
 0x1ed   :  { %v278_v34 = vadd.f32 1e-05, %v277_v33 }
 0x1ef   :  { %349 = vrsqrt.f32 %v278_v34  ;;  %vm285_vm8 = vweird.f32 %v278_v34 }
 0x1f5   :  { %v350_v35 = vpop.eup %349 }
 0x1f6   :  { %v280_v36 = vmul.f32 %v350_v35, %v278_v34  ;;  %vm286_vm7 = vweird.f32 %v350_v35 }
 0x1f7   :  { %vm287_vm9 = vmor %vm285_vm8, %vm286_vm7 }
 0x1f8   :  { %v281_v37 = vmul.f32 %v350_v35, %v280_v36 }
 0x1fa   :  { %v282_v38 = vmul.f32 0.5, %v281_v37 }
 0x1fc   :  { %v283_v39 = vsub.f32 1.5, %v282_v38 }
 0x1fe   :  { %v284_v40 = vmul.f32 %v350_v35, %v283_v39 }
 0x200   :  { %v288_v41 = vsel %vm287_vm9, %v350_v35, %v284_v40 }
 0x201   :  { %v289_v42 = vmul.f32 %v288_v41, %v269_v25 }
 0x203   :  { %v296_v44 = vmul.f32 %v294_v43, %v289_v42 }
 0x205   :  { %v303_v46 = vadd.f32 %v301_v45, %v296_v44 }
 0x207   :  { %304 = vst [vmem:[#allocation2] sm:$0xff] %v303_v46 }
 0x208   :  { %315 = dma.vmem_to_hbm [thread:$0]  %s311_s5, 128, %s313_s11, [#allocation3]  }
 0x209   :  { %375 = dma.done.wait [#allocation3], 128  }
 0x20a   :  { %376 = vsyncadd [#allocation3], 4294967168 }
 0x20b   :  { %320 = vsyncpa [#allocation3], 1 }

</bundles_post_ra>
